<compile_context>
chip_gen: v7x
topology: tpu7x:2x2x1
jax: 0.10.0
libtpu: 0.0.40
codegen_flags: <defaults>
</compile_context>

<pallas_src>
from functools import partial

import jax
import jax.numpy as jnp
from jax import lax
from jax.experimental import pallas as pl
from jax.experimental.pallas import tpu as pltpu


def _nd_loss_kernel(labels_ref, s_ref, t_ref, ect_ref, out_ref, acc_ref, *,
                    factor, batch, tile_b, tiles_per_split):
    core = pl.program_id(0)      # "parallel" axis (TensorCore split on v7x)
    step = pl.program_id(1)      # "arbitrary" axis (batch tiles)

    @pl.when(step == 0)
    def _init():
        acc_ref[...] = jnp.zeros_like(acc_ref)

    s = s_ref[...].astype(jnp.float32)            # (TB, D)
    t = t_ref[...].astype(jnp.float32)            # (TB, D)
    labels = labels_ref[...]                      # (TB, 1) int32

    tb = s.shape[0]
    num_class = ect_ref.shape[1]

    # dot(s_i, e_c_{label_i}) via one bf16 MXU pass against the resident
    # unit-norm class table, then a masked row-select (no HBM gather).
    scores = jnp.dot(s.astype(jnp.bfloat16), ect_ref[...],
                     preferred_element_type=jnp.float32)           # (TB, C)
    cls = lax.broadcasted_iota(jnp.int32, (tb, num_class), 1)
    s_dot_c = jnp.sum(jnp.where(cls == labels, scores, 0.0),
                      axis=-1, keepdims=True)                      # (TB, 1)

    # max(||s||, ||t||) via squared norms + one rsqrt (EUP), no sqrt/divide.
    s_sq = jnp.sum(s * s, axis=-1, keepdims=True)
    t_sq = jnp.sum(t * t, axis=-1, keepdims=True)
    denom_sq = jnp.maximum(s_sq, t_sq)

    # Mask rows that only exist because of sublane padding / partial edge blocks.
    row0 = (core * tiles_per_split + step) * tile_b
    rows = row0 + lax.broadcasted_iota(jnp.int32, (tb, 1), 0)
    valid = rows < batch
    denom_sq = jnp.where(valid, denom_sq, 1.0)
    per_sample = jnp.where(valid, 1.0 - s_dot_c * lax.rsqrt(denom_sq), 0.0)

    acc_ref[...] += jnp.sum(per_sample, keepdims=True)             # (1, 1)

    @pl.when(step == pl.num_programs(1) - 1)
    def _finalize():
        out_ref[...] = (acc_ref[...] * jnp.float32(factor / batch)).reshape(1, 1, 1)


def _vmem_capacity_bytes():
    try:
        info = pltpu.get_tpu_info()
        cap = int(getattr(info, "vmem_capacity_bytes", 0))
        if cap > 0:
            return cap
    except Exception:
        pass
    return 64 << 20   # conservative fallback (v7x per-TC size)


def _num_tensorcores():
    try:
        kind = jax.devices()[0].device_kind.lower()
        if "v7" in kind:
            return 2
    except Exception:
        pass
    return 1


def _plan_tiles(batch8, d, num_class, in_itemsize):
    """Pick the batch tile TB and an explicit scoped-VMEM limit."""
    cap = _vmem_capacity_bytes()
    # Plan within ~75% of physical VMEM, never beyond 48 MiB even on 128 MiB
    # chips (v5e/v6e = 128 MiB, v7x = 64 MiB per TensorCore).
    budget = min(cap * 3 // 4, 48 << 20)

    per_row = (2 * 2 * d * in_itemsize   # s,t HBM streams, double-buffered
               + 2 * d * 4               # in-kernel f32 casts of s and t
               + d * 2                   # bf16 cast of s fed to the MXU
               + 2 * num_class * 4       # (TB, C) scores + class-iota intermediates
               + 2 * 4 + 64)             # labels (double-buffered) + misc
    table_bytes = 2 * d * num_class * 2  # resident bf16 table (2 pipeline buffers)

    avail = budget - table_bytes - (1 << 20)
    tb = max(8, (avail // per_row) // 8 * 8) if avail > per_row * 8 else 8
    tb = int(min(tb, 2048, batch8))

    vmem_est = table_bytes + tb * per_row + (1 << 20)
    vmem_limit = int(min(56 << 20, max(16 << 20, vmem_est * 5 // 4)))
    return tb, vmem_limit


def direct_norm_loss(s_emb, t_emb, t_emb_table, labels, nd_loss_factor=1.0):
    """s_emb, t_emb: (B, D); t_emb_table: (num_class, D); labels: (B,) int."""
    B, D = s_emb.shape
    C = t_emb_table.shape[0]
    labels = labels.astype(jnp.int32)

    # One-time normalization of the class-center table (replaces the per-sample
    # center/||center|| in the reference); stored bf16 for a single MXU pass.
    tbl = t_emb_table.astype(jnp.float32)
    e_c = tbl * lax.rsqrt(jnp.sum(tbl * tbl, axis=-1, keepdims=True))
    e_ct = e_c.T.astype(jnp.bfloat16)                  # (D, C)

    # Pad only to the sublane multiple (<= 7 rows); partial edge blocks plus
    # the in-kernel mask handle everything else — no big stream copies in HBM.
    B8 = ((B + 7) // 8) * 8
    if B8 != B:
        pad = B8 - B
        s_emb = jnp.pad(s_emb, ((0, pad), (0, 0)))
        t_emb = jnp.pad(t_emb, ((0, pad), (0, 0)))
        labels = jnp.pad(labels, (0, pad))
    labels2d = labels.reshape(B8, 1)

    in_itemsize = jnp.dtype(s_emb.dtype).itemsize
    TB, vmem_limit = _plan_tiles(B8, D, C, in_itemsize)

    n_tiles = -(-B8 // TB)
    ncores = _num_tensorcores()
    ns = 2 if (ncores >= 2 and n_tiles % 2 == 0) else 1
    tiles_per_split = n_tiles // ns

    kernel = partial(_nd_loss_kernel, factor=float(nd_loss_factor), batch=B,
                     tile_b=TB, tiles_per_split=tiles_per_split)

    def batch_map(core, step):
        return (core * tiles_per_split + step, 0)

    partials = pl.pallas_call(
        kernel,
        out_shape=jax.ShapeDtypeStruct((ns, 1, 1), jnp.float32),
        grid_spec=pltpu.PrefetchScalarGridSpec(
            num_scalar_prefetch=0,
            grid=(ns, tiles_per_split),
            in_specs=[
                pl.BlockSpec((TB, 1), batch_map),                 # labels
                pl.BlockSpec((TB, D), batch_map),                 # student emb
                pl.BlockSpec((TB, D), batch_map),                 # teacher emb
                pl.BlockSpec((D, C), lambda core, step: (0, 0)),  # e_c^T, resident
            ],
            out_specs=pl.BlockSpec((1, 1, 1), lambda core, step: (core, 0, 0)),
            scratch_shapes=[pltpu.VMEM((1, 1), jnp.float32)],
        ),
        compiler_params=pltpu.CompilerParams(
            dimension_semantics=("parallel", "arbitrary"),
            vmem_limit_bytes=vmem_limit,
        ),
    )(labels2d, s_emb, t_emb, e_ct)

    return jnp.sum(partials)


def _reference(s_emb, t_emb, t_emb_table, labels, nd_loss_factor=1.0):
    centers = jnp.take(t_emb_table, labels, axis=0)
    e_c = centers / jnp.linalg.norm(centers, axis=-1, keepdims=True)
    s_norm = jnp.linalg.norm(s_emb, axis=-1)
    t_norm = jnp.linalg.norm(t_emb, axis=-1)
    max_norm = jnp.maximum(s_norm, t_norm)
    dot = jnp.sum(s_emb * e_c, axis=-1)
    loss = jnp.sum(1.0 - dot / max_norm) * nd_loss_factor
    return loss / s_emb.shape[0]


if __name__ == "__main__":
    key = jax.random.PRNGKey(0)
    k1, k2, k3, k4 = jax.random.split(key, 4)

    B, D, NUM_CLASS = 2, 32, 10
    ND_LOSS_FACTOR = 1.0

    s_emb = jax.random.normal(k1, (B, D), dtype=jnp.float32)
    t_emb = jax.random.normal(k2, (B, D), dtype=jnp.float32)
    # Dense class-center table standing in for the T_EMB dict.
    t_emb_table = jax.random.normal(k3, (NUM_CLASS, D), dtype=jnp.float32)
    labels = jax.random.randint(k4, (B,), 0, NUM_CLASS, dtype=jnp.int32)

    out = direct_norm_loss(s_emb, t_emb, t_emb_table, labels, ND_LOSS_FACTOR)
    out = jax.block_until_ready(out)

    ref = _reference(s_emb, t_emb, t_emb_table, labels, ND_LOSS_FACTOR)
    # bf16 single-pass MXU vs fp32 reference: allow ~bf16-level tolerance.
    assert jnp.allclose(out, ref, rtol=1e-3, atol=5e-3), (out, ref)

    print("KERNEL_OK")
</pallas_src>

<mosaic_0001>
module attributes {stable_mosaic.version = 11 : i64} {
  func.func @_nd_loss_kernel(%arg0: i32, %arg1: i32, %arg2: memref<8x1xi32, #tpu.memory_space<vmem>>, %arg3: memref<8x32xf32, #tpu.memory_space<vmem>>, %arg4: memref<8x32xf32, #tpu.memory_space<vmem>>, %arg5: memref<32x10xbf16, #tpu.memory_space<vmem>>, %arg6: memref<1x1x1xf32, #tpu.memory_space<vmem>>, %arg7: memref<1x1xf32, #tpu.memory_space<vmem>>) attributes {dimension_semantics = [#tpu.dimension_semantics<parallel>, #tpu.dimension_semantics<arbitrary>], iteration_bounds = array<i64: 1, 1>, scalar_prefetch = 0 : i64, scratch_operands = 1 : i64, tpu.core_type = #tpu.core_type<tc>, window_params = [{transform_indices = @transform_0, window_bounds = array<i64: 8, 1>}, {transform_indices = @transform_1, window_bounds = array<i64: 8, 32>}, {transform_indices = @transform_2, window_bounds = array<i64: 8, 32>}, {pipeline_mode = #tpu.pipeline_mode<synchronous>, transform_indices = @transform_3, window_bounds = array<i64: 32, 10>}, {transform_indices = @transform_4, window_bounds = array<i64: 1, 1, 1>}]} {
    %c0_i32 = arith.constant 0 : i32
    %0 = arith.cmpi eq, %arg1, %c0_i32 : i32
    %1 = arith.extui %0 : i1 to i32
    %c0_i32_0 = arith.constant 0 : i32
    %2 = arith.cmpi ne, %1, %c0_i32_0 : i32
    scf.if %2 {
      %cst_22 = arith.constant 0.000000e+00 : f32
      %50 = vector.broadcast %cst_22 : f32 to vector<1x1xf32>
      %c0_23 = arith.constant 0 : index
      %c0_24 = arith.constant 0 : index
      %51 = vector.load %arg7[%c0_23, %c0_24] : memref<1x1xf32, #tpu.memory_space<vmem>>, vector<1x1xf32>
      tpu.vector_store %arg7[%c0_23, %c0_24], %50 {strides = array<i32>} : memref<1x1xf32, #tpu.memory_space<vmem>>, vector<1x1xf32>,
    } else {
    }
    %c0 = arith.constant 0 : index
    %c0_1 = arith.constant 0 : index
    %3 = vector.load %arg3[%c0, %c0_1] : memref<8x32xf32, #tpu.memory_space<vmem>>, vector<8x32xf32>
    %c0_2 = arith.constant 0 : index
    %c0_3 = arith.constant 0 : index
    %4 = vector.load %arg4[%c0_2, %c0_3] : memref<8x32xf32, #tpu.memory_space<vmem>>, vector<8x32xf32>
    %c0_4 = arith.constant 0 : index
    %c0_5 = arith.constant 0 : index
    %5 = vector.load %arg2[%c0_4, %c0_5] : memref<8x1xi32, #tpu.memory_space<vmem>>, vector<8x1xi32>
    %6 = arith.truncf %3 : vector<8x32xf32> to vector<8x32xbf16>
    %c0_6 = arith.constant 0 : index
    %c0_7 = arith.constant 0 : index
    %7 = vector.load %arg5[%c0_6, %c0_7] : memref<32x10xbf16, #tpu.memory_space<vmem>>, vector<32x10xbf16>
    %cst = arith.constant dense<0.000000e+00> : vector<8x10xf32>
    %8 = tpu.matmul %6, %7, %cst {dimension_numbers = #tpu.dot_dimension_numbers<[1], [0], [0], [1], [0, 0, 1, 1], [], []>} : vector<8x32xbf16>, vector<32x10xbf16>, vector<8x10xf32> -> vector<8x10xf32>
    %9 = tpu.iota {dimensions = array<i32: 1>} : vector<8x10xi32>
    %10 = vector.broadcast %5 : vector<8x1xi32> to vector<8x10xi32>
    %11 = arith.cmpi eq, %9, %10 : vector<8x10xi32>
    %cst_8 = arith.constant 0.000000e+00 : f32
    %12 = vector.broadcast %cst_8 : f32 to vector<8x10xf32>
    %13 = arith.select %11, %8, %12 : vector<8x10xi1>, vector<8x10xf32>
    %cst_9 = arith.constant dense<0.000000e+00> : vector<8xf32>
    %14 = vector.multi_reduction <add>, %13, %cst_9 [1] : vector<8x10xf32> to vector<8xf32>
    %15 = vector.shape_cast %14 : vector<8xf32> to vector<8x1xf32>
    %16 = arith.mulf %3, %3 : vector<8x32xf32>
    %cst_10 = arith.constant dense<0.000000e+00> : vector<8xf32>
    %17 = vector.multi_reduction <add>, %16, %cst_10 [1] : vector<8x32xf32> to vector<8xf32>
    %18 = vector.shape_cast %17 : vector<8xf32> to vector<8x1xf32>
    %19 = arith.mulf %4, %4 : vector<8x32xf32>
    %cst_11 = arith.constant dense<0.000000e+00> : vector<8xf32>
    %20 = vector.multi_reduction <add>, %19, %cst_11 [1] : vector<8x32xf32> to vector<8xf32>
    %21 = vector.shape_cast %20 : vector<8xf32> to vector<8x1xf32>
    %22 = arith.maximumf %18, %21 : vector<8x1xf32>
    %c1_i32 = arith.constant 1 : i32
    %23 = arith.muli %arg0, %c1_i32 : i32
    %24 = arith.addi %23, %arg1 : i32
    %c8_i32 = arith.constant 8 : i32
    %25 = arith.muli %24, %c8_i32 : i32
    %26 = tpu.iota {dimensions = array<i32: 0>} : vector<8x1xi32>
    %27 = vector.broadcast %25 : i32 to vector<8x1xi32>
    %28 = arith.addi %27, %26 : vector<8x1xi32>
    %c2_i32 = arith.constant 2 : i32
    %29 = vector.broadcast %c2_i32 : i32 to vector<8x1xi32>
    %30 = arith.cmpi slt, %28, %29 : vector<8x1xi32>
    %cst_12 = arith.constant 1.000000e+00 : f32
    %31 = vector.broadcast %cst_12 : f32 to vector<8x1xf32>
    %32 = arith.select %30, %22, %31 : vector<8x1xi1>, vector<8x1xf32>
    %33 = math.rsqrt %32 : vector<8x1xf32>
    %34 = arith.mulf %15, %33 : vector<8x1xf32>
    %cst_13 = arith.constant 1.000000e+00 : f32
    %35 = vector.broadcast %cst_13 : f32 to vector<8x1xf32>
    %36 = arith.subf %35, %34 : vector<8x1xf32>
    %cst_14 = arith.constant 0.000000e+00 : f32
    %37 = vector.broadcast %cst_14 : f32 to vector<8x1xf32>
    %38 = arith.select %30, %36, %37 : vector<8x1xi1>, vector<8x1xf32>
    %c0_15 = arith.constant 0 : index
    %c0_16 = arith.constant 0 : index
    %39 = vector.load %arg7[%c0_15, %c0_16] : memref<1x1xf32, #tpu.memory_space<vmem>>, vector<1x1xf32>
    %40 = vector.shape_cast %38 : vector<8x1xf32> to vector<1x8x1xf32>
    %cst_17 = arith.constant dense<0.000000e+00> : vector<1xf32>
    %41 = vector.multi_reduction <add>, %40, %cst_17 [1, 2] : vector<1x8x1xf32> to vector<1xf32>
    %42 = vector.shape_cast %41 : vector<1xf32> to vector<1x1x1xf32>
    %43 = vector.extract %42[0, 0, 0] : f32 from vector<1x1x1xf32>
    %44 = vector.broadcast %43 : f32 to vector<1x1xf32>
    %45 = arith.addf %39, %44 : vector<1x1xf32>
    %c0_18 = arith.constant 0 : index
    %c0_19 = arith.constant 0 : index
    %46 = vector.load %arg7[%c0_18, %c0_19] : memref<1x1xf32, #tpu.memory_space<vmem>>, vector<1x1xf32>
    tpu.vector_store %arg7[%c0_18, %c0_19], %45 {strides = array<i32>} : memref<1x1xf32, #tpu.memory_space<vmem>>, vector<1x1xf32>,
    %c0_i32_20 = arith.constant 0 : i32
    %47 = arith.cmpi eq, %arg1, %c0_i32_20 : i32
    %48 = arith.extui %47 : i1 to i32
    %c0_i32_21 = arith.constant 0 : i32
    %49 = arith.cmpi ne, %48, %c0_i32_21 : i32
    scf.if %49 {
      %c0_22 = arith.constant 0 : index
      %c0_23 = arith.constant 0 : index
      %50 = vector.load %arg7[%c0_22, %c0_23] : memref<1x1xf32, #tpu.memory_space<vmem>>, vector<1x1xf32>
      %cst_24 = arith.constant 5.000000e-01 : f32
      %51 = vector.broadcast %cst_24 : f32 to vector<1x1xf32>
      %52 = arith.mulf %50, %51 : vector<1x1xf32>
      %53 = vector.shape_cast %52 : vector<1x1xf32> to vector<1x1x1xf32>
      %c0_25 = arith.constant 0 : index
      %c0_26 = arith.constant 0 : index
      %c0_27 = arith.constant 0 : index
      %54 = vector.load %arg6[%c0_25, %c0_26, %c0_27] : memref<1x1x1xf32, #tpu.memory_space<vmem>>, vector<1x1x1xf32>
      tpu.vector_store %arg6[%c0_25, %c0_26, %c0_27], %53 {strides = array<i32>} : memref<1x1x1xf32, #tpu.memory_space<vmem>>, vector<1x1x1xf32>,
    } else {
    }
    return
  }
  func.func @transform_0(%arg0: i32, %arg1: i32) -> (i32, i32) {
    %c1_i32 = arith.constant 1 : i32
    %0 = arith.muli %arg0, %c1_i32 : i32
    %1 = arith.addi %0, %arg1 : i32
    %c0_i32 = arith.constant 0 : i32
    %c0_i32_0 = arith.constant 0 : i32
    return %1, %c0_i32 : i32, i32
  }
  func.func @transform_1(%arg0: i32, %arg1: i32) -> (i32, i32) {
    %c1_i32 = arith.constant 1 : i32
    %0 = arith.muli %arg0, %c1_i32 : i32
    %1 = arith.addi %0, %arg1 : i32
    %c0_i32 = arith.constant 0 : i32
    %c0_i32_0 = arith.constant 0 : i32
    return %1, %c0_i32 : i32, i32
  }
  func.func @transform_2(%arg0: i32, %arg1: i32) -> (i32, i32) {
    %c1_i32 = arith.constant 1 : i32
    %0 = arith.muli %arg0, %c1_i32 : i32
    %1 = arith.addi %0, %arg1 : i32
    %c0_i32 = arith.constant 0 : i32
    %c0_i32_0 = arith.constant 0 : i32
    return %1, %c0_i32 : i32, i32
  }
  func.func @transform_3(%arg0: i32, %arg1: i32) -> (i32, i32) {
    %c0_i32 = arith.constant 0 : i32
    %c0_i32_0 = arith.constant 0 : i32
    %c0_i32_1 = arith.constant 0 : i32
    return %c0_i32, %c0_i32_0 : i32, i32
  }
  func.func @transform_4(%arg0: i32, %arg1: i32) -> (i32, i32, i32) {
    %c0_i32 = arith.constant 0 : i32
    %c0_i32_0 = arith.constant 0 : i32
    %c0_i32_1 = arith.constant 0 : i32
    return %arg0, %c0_i32, %c0_i32_0 : i32, i32, i32
  }
}

</mosaic_0001>

<bundles_post_ra>
// kernel: tpu_custom_call.1
= control target key start
LH: loop header
LB: loop body
LE: loop exit
PB: predicated region body
PF: predicated region fallthrough
CT: control target
= control target key end

     0   :  { %v275_v1 = vmov 0.0   ;;  %vm276_vm0 = vmmov 0   ;;  %v277_v6 = vmov 0   ;;  %s334_s0 = inlined_call_operand.vmem [shape: s32[8,1], index: 0, kind: input, shape index: {}]   ;;  %s335_s1 = inlined_call_operand.vmem [shape: f32[8,32], index: 1, kind: input, shape index: {}]   ;;  %s336_s2 = inlined_call_operand.vmem [shape: f32[8,32], index: 2, kind: input, shape index: {}]   ;;  %s337_s3 = inlined_call_operand.vmem [shape: bf16[32,10], index: 3, kind: input, shape index: {}]   ;;  %s338_s4 = inlined_call_operand.hbm [shape: f32[1,1,1], index: 4, kind: output, shape index: {}]  }
   0x1   :  { %v247_v0 = vld [vmem:[%s337_s3] sm:$0xff]   ;;  %232 = vmatprep.subr.bf16.mxu0 %v275_v1  ;;  %v248_v2 = vld [vmem:[%s337_s3 + $0x8] sm:$0xff]   ;;  %236 = vmatprep.mubr.msk.bf16.mxu0 %vm276_vm0, %v275_v1 }
   0x2   :  { %233 = vmatpush3.bf16.msra.mxu0 %v247_v0  ;;  %v76_v3 = vld [vmem:[%s335_s1] sm:$0xff]  ;;  %246 = vset.pattern.permute.xlu0 %v277_v6 }
   0x3   :  { %v78_v4 = vld [vmem:[%s334_s0] sm:$0xff]  ;;  %234 = vmatprep.subr.bf16.mxu0 %v275_v1 }
   0x4   :  { %v77_v5 = vld [vmem:[%s336_s2] sm:$0xff] }
   0x5   :  { %v155_v7 = vmul.f32 %v77_v5, %v77_v5 }
   0x6   :  { %9 = vsyncpa [#allocation4], 0  ;;  %vm96_vm1 = vcmask 261120   ;;  %143 = vperm.xlu0 %246, %v78_v4   ;;  %v79_v8 = vpack.c.bf16 %v76_v3, %v76_v3  ;;  %235 = vmatpush3.bf16.msra.mxu0 %v248_v2  ;;  %v151_v10 = vmul.f32 %v76_v3, %v76_v3  ;;  %v140_v12 = vlaneseq  ;;  %s278_s1 = smov [#allocation3]  }
   0x7   :  { %v156_v9 = vsel %vm96_vm1, %v155_v7, 0.0  ;;  %vm147_vm3 = vcmask 80896   ;;  %vm173_vm5 = vcmask 7168   ;;  %vm74_vm6 = vcmask 0   ;;  %s200_s2 = sshll.u32 %s278_s1, 4  ;;  %s201_s2 = int_to_ptr.vmem [resolvable:$true] %s200_s2 }
   0x8   :  { %157 = vadd.xlane.f32.xlu1 %v156_v9  ;;  %v152_v11 = vsel %vm96_vm1, %v151_v10, 0.0  ;;  %v141_v13 = vand.u32 127, %v140_v12  ;;  %v163_v22 = vshrl.u32 %v140_v12, 7  ;;  %75 = vst.msk [vmem:[#allocation2] sm:$0x1] %vm74_vm6, %v275_v1  ;;  %s251_s3 = scalar_lea.vmem %s201_s2, 16  ;;  %p256_p1 = scmp.lt.s32.totalorder %s201_s2, %s201_s2 }
   0x9   :  { %237 = vmatmul.mubr.msk.bf16.vlgmr.msra.gmra.mrb[0].mxu0 %vm96_vm1, %v79_v8  ;;  %p252_p0 = scmp.ne.s32.totalorder %s201_s2, %s251_s3  ;;  %s255_s25 = scalar_lea.vmem %s201_s2, 32 }
   0xa   :  { %vm166_vm4 = vcmp.lt.s32.totalorder %v163_v22, 2  ;;  %p257_p2 = scmp.lt.s32.totalorder %s255_s25, %s251_s3 }
   0xc   :  { %p258_p3 = por %p257_p2, %p256_p1 }
   0xe   :  { %p259_p4 = pnand %p258_p3, %p252_p0 }
   0xf   :  { %v172_v39 = vld [vmem:[#allocation2] sm:$0x1] }
  0x25   :  { %153 = vadd.xlane.f32.xlu0 %v152_v11 }
  0x85   :  { %v144_v14 = vpop.permute.xlu0 %143 }
  0x86   :  { %vm145_vm2 = vcmp.eq.s32.totalorder %v141_v13, %v144_v14 }
  0x95   :  { %v158_v21 = vpop.xlane.xlu1 %157 }
  0xb2   :  { %v154_v23 = vpop.xlane.xlu0 %153 }
  0xb3   :  { %v159_v24 = vmax.f32 %v154_v23, %v158_v21 }
  0xb5   :  { %v167_v25 = vsel %vm166_vm4, %v159_v24, 1.0 }
  0xb6   :  { %249 = vrsqrt.f32 %v167_v25 }
  0xc0   :  { %v250_v26 = vpop.eup %249 }
  0xdc   :  { %v134_v15 = vpop.f32.mrb[0].mxu0 }
  0xdd   :  { %v146_v16 = vsel %vm145_vm2, %v134_v15, 0.0  ;;  %v238_v17 = vpop.f32.mrb[1].mxu0 }
  0xde   :  { %v137_v18 = vpop.f32.mrb[2].mxu0  ;;  %v148_v19 = vsel %vm147_vm3, %v146_v16, 0.0 }
  0xdf   :  { %149 = vadd.xlane.f32.xlu1 %v148_v19  ;;  %v239_v20 = vpop.f32.mrb[3].mxu0 }
 0x16c   :  { %v150_v27 = vpop.xlane.xlu1 %149 }
 0x16d   :  { %v169_v28 = vmul.f32 %v250_v26, %v150_v27 }
 0x16f   :  { %v170_v29 = vsub.f32 1.0, %v169_v28 }
 0x171   :  { %v171_v30 = vsel %vm166_vm4, %v170_v29, 0.0 }
 0x172   :  { %v174_v31 = vsel %vm173_vm5, %v171_v30, 0.0 }
 0x173   :  { %175 = vadd.xlane.f32.xlu1 %v174_v31 }
 0x200   :  { %v176_v32 = vpop.xlane.xlu1 %175 }
 0x201   :  { %v177_v33 = vrot.slane %v176_v32, 4 }
 0x203   :  { %v178_v34 = vadd.f32 %v177_v33, %v176_v32 }
 0x205   :  { %v179_v35 = vrot.slane %v178_v34, 2 }
 0x207   :  { %v180_v36 = vadd.f32 %v179_v35, %v178_v34 }
 0x209   :  { %v181_v37 = vrot.slane %v180_v36, 1 }
 0x20b   :  { %v182_v38 = vadd.f32 %v181_v37, %v180_v36 }
 0x20d   :  { %240 = vpush %v182_v38 }
 0x23e   :  { %s241_s0 = spop %240 }
 0x23f   :  { %v184_v40 = vstv %s241_s0 }
 0x240   :  { %v185_v41 = vadd.f32 %v184_v40, %v172_v39 }
 0x242   :  { %187 = vst.msk [vmem:[#allocation2] sm:$0x1] %vm74_vm6, %v185_v41 }
 0x249   :  { %v191_v42 = vld [vmem:[#allocation2] sm:$0x1] }
 0x24a   :  { %v192_v43 = vmul.f32 0.5, %v191_v42 }
 0x24c   :  { %193 = vst.msk [vmem:[#allocation3] sm:$0x1] %vm74_vm6, %v192_v43 }
 0x24d   :  { %262 = shalt.err (!%p259_p4)
}
 0x24e   :  { %s263_s28 = scalar_lea.hbm %s338_s4, 16 }
 0x24f   :  { %p264_p5 = scmp.ne.s32.totalorder %s338_s4, %s263_s28  ;;  %p267_p6 = scmp.lt.u32.totalorder %s263_s28, %s338_s4 }
 0x251   :  { %p269_p7 = pnand %p267_p6, %p264_p5 }
 0x253   :  { %272 = shalt.err (!%p269_p7)
}
 0x254   :  { %203 = dma.vmem_to_hbm [thread:$0]  %s201_s2, 16, %s338_s4, [#allocation4]  }
 0x255   :  { %273 = dma.done.wait [#allocation4], 16  }
 0x256   :  { %274 = vsyncadd [#allocation4], 4294967280 }
 0x257   :  { %207 = vsyncpa [#allocation4], 1 }

</bundles_post_ra>
